<compile_context>
chip_gen: v7x
topology: tpu7x:2x2x1
jax: 0.10.0
libtpu: 0.0.40
codegen_flags: <defaults>
</compile_context>

<pallas_src>
import functools

import jax
import jax.numpy as jnp
from jax.experimental import pallas as pl
from jax.experimental.pallas import tpu as pltpu


def _round_up(x, m):
    return ((x + m - 1) // m) * m


# ----------------------------------------------------------------------------
# Pallas kernel: fused clamp + pow(p) + mean-reduce + pow(1/p)
# ----------------------------------------------------------------------------
def _gem_pool_kernel(x_ref, o_ref, acc_ref, *, p, eps, inv_count, pad_correction):
    t = pl.program_id(1)  # reduction-tile index (innermost, "arbitrary")

    @pl.when(t == 0)
    def _():
        acc_ref[...] = jnp.zeros_like(acc_ref)

    x = x_ref[...].astype(jnp.float32)                     # (TR, THW)
    # clamp(min=eps) then x**p; x > 0 after clamp so exp(p*log(x)) is exact math
    # and lowers cleanly to EUP log/exp.
    xp = jnp.exp(p * jnp.log(jnp.maximum(x, eps)))
    acc_ref[...] += jnp.sum(xp, axis=1, keepdims=True)     # lane reduce -> (TR, 1)

    @pl.when(t == pl.num_programs(1) - 1)
    def _():
        # Remove the contribution of zero-padded lanes (each equals eps**p after
        # clamp), take the mean over the true bin size, then the 1/p power.
        s = acc_ref[...] - pad_correction
        mean = jnp.maximum(s * inv_count, eps ** p)        # exact lower bound; guards fp
        o_ref[...] = jnp.exp(jnp.log(mean) * (1.0 / p)).astype(o_ref.dtype)


def gem_pool_rows(x2d, *, p, eps, row_tile=256, hw_tile=2048):
    """GeM-pool each row of x2d: (rows, hw) -> (rows,).

    Rows map to the sublane axis, bin elements to the lane axis.  Both axes are
    zero-padded to the tile grain; padding is corrected exactly in the kernel.
    """
    rows, hw = x2d.shape

    t_r = min(row_tile, _round_up(rows, 8))       # sublane tile (multiple of 8)
    t_hw = min(hw_tile, _round_up(hw, 128))       # lane tile (multiple of 128)
    rows_pad = _round_up(rows, t_r)
    hw_pad = _round_up(hw, t_hw)

    xp = jnp.pad(x2d, ((0, rows_pad - rows), (0, hw_pad - hw)))

    n_pad = hw_pad - hw
    pad_correction = float(n_pad) * (float(eps) ** float(p))
    inv_count = 1.0 / float(hw)

    grid = (rows_pad // t_r, hw_pad // t_hw)      # reduction axis last

    out = pl.pallas_call(
        functools.partial(
            _gem_pool_kernel,
            p=float(p), eps=float(eps),
            inv_count=inv_count, pad_correction=pad_correction),
        out_shape=jax.ShapeDtypeStruct((rows_pad, 1), x2d.dtype),
        grid=grid,
        in_specs=[pl.BlockSpec((t_r, t_hw), lambda r, t: (r, t))],
        out_specs=pl.BlockSpec((t_r, 1), lambda r, t: (r, 0)),
        scratch_shapes=[pltpu.VMEM((t_r, 1), jnp.float32)],
        compiler_params=pltpu.CompilerParams(
            dimension_semantics=("parallel", "arbitrary")),
    )(xp)
    return out[:rows, 0]


# ----------------------------------------------------------------------------
# Module-level forward: GeneralizedMeanPooling(norm=p, output_size, eps)
# ----------------------------------------------------------------------------
def generalized_mean_pooling(x_nchw, *, p, output_size=1, eps=1e-6):
    N, C, H, W = x_nchw.shape
    if isinstance(output_size, int):
        oh = ow = output_size
    else:
        oh, ow = output_size
    oh = H if oh is None else oh
    ow = W if ow is None else ow

    if H % oh != 0 or W % ow != 0:
        # TODO(synk): non-divisible adaptive_avg_pool2d (overlapping / uneven bins) not implemented.
        raise NotImplementedError("adaptive pooling with non-divisible output_size")

    bh, bw = H // oh, W // ow
    if oh == 1 and ow == 1:
        # Global pooling: pure reshape, no relayout.
        x2d = x_nchw.reshape(N * C, H * W)
    else:
        x6 = x_nchw.reshape(N, C, oh, bh, ow, bw)
        x2d = jnp.transpose(x6, (0, 1, 2, 4, 3, 5)).reshape(N * C * oh * ow, bh * bw)

    pooled = gem_pool_rows(x2d, p=p, eps=eps)
    return pooled.reshape(N, C, oh, ow)


# ----------------------------------------------------------------------------
# Pure-JAX reference (matches torch: clamp -> pow(p) -> adaptive_avg_pool2d -> pow(1/p))
# ----------------------------------------------------------------------------
def reference(x_nchw, *, p, output_size=1, eps=1e-6):
    N, C, H, W = x_nchw.shape
    if isinstance(output_size, int):
        oh = ow = output_size
    else:
        oh, ow = output_size
    oh = H if oh is None else oh
    ow = W if ow is None else ow
    bh, bw = H // oh, W // ow
    xc = jnp.power(jnp.maximum(x_nchw, eps), p)
    m = xc.reshape(N, C, oh, bh, ow, bw).mean(axis=(3, 5))
    return jnp.power(m, 1.0 / p)


# ----------------------------------------------------------------------------
# Main
# ----------------------------------------------------------------------------
if __name__ == "__main__":
    key = jax.random.PRNGKey(0)
    N, C, H, W = 2, 4, 16, 16
    p_norm = 3.0
    eps = 1e-6

    x = jax.random.normal(key, (N, C, H, W), jnp.float32)

    # Default DELG usage: output_size = 1 (global GeM pooling).
    out = generalized_mean_pooling(x, p=p_norm, output_size=1, eps=eps)
    out = jax.block_until_ready(out)
    ref = jax.block_until_ready(reference(x, p=p_norm, output_size=1, eps=eps))
    assert out.shape == (N, C, 1, 1), out.shape
    assert jnp.allclose(out, ref, atol=1e-4, rtol=1e-4), float(jnp.max(jnp.abs(out - ref)))

    # Also exercise a divisible non-trivial output_size.
    out2 = generalized_mean_pooling(x, p=p_norm, output_size=2, eps=eps)
    out2 = jax.block_until_ready(out2)
    ref2 = jax.block_until_ready(reference(x, p=p_norm, output_size=2, eps=eps))
    assert out2.shape == (N, C, 2, 2), out2.shape
    assert jnp.allclose(out2, ref2, atol=1e-4, rtol=1e-4), float(jnp.max(jnp.abs(out2 - ref2)))

    print("KERNEL_OK")
</pallas_src>

<mosaic_0001>
module attributes {stable_mosaic.version = 11 : i64} {
  func.func @_gem_pool_kernel(%arg0: i32, %arg1: i32, %arg2: memref<8x256xf32, #tpu.memory_space<vmem>>, %arg3: memref<8x1xf32, #tpu.memory_space<vmem>>, %arg4: memref<8x1xf32, #tpu.memory_space<vmem>>) attributes {dimension_semantics = [#tpu.dimension_semantics<parallel>, #tpu.dimension_semantics<arbitrary>], iteration_bounds = array<i64: 1, 1>, scalar_prefetch = 0 : i64, scratch_operands = 1 : i64, tpu.core_type = #tpu.core_type<tc>, window_params = [{transform_indices = @transform_0, window_bounds = array<i64: 8, 256>}, {transform_indices = @transform_1, window_bounds = array<i64: 8, 1>}]} {
    %c0_i32 = arith.constant 0 : i32
    %0 = arith.cmpi eq, %arg1, %c0_i32 : i32
    %1 = arith.extui %0 : i1 to i32
    %c0_i32_0 = arith.constant 0 : i32
    %2 = arith.cmpi ne, %1, %c0_i32_0 : i32
    scf.if %2 {
      %cst_10 = arith.constant 0.000000e+00 : f32
      %18 = vector.broadcast %cst_10 : f32 to vector<8x1xf32>
      %c0_11 = arith.constant 0 : index
      %c0_12 = arith.constant 0 : index
      %19 = vector.load %arg4[%c0_11, %c0_12] : memref<8x1xf32, #tpu.memory_space<vmem>>, vector<8x1xf32>
      tpu.vector_store %arg4[%c0_11, %c0_12], %18 {strides = array<i32>} : memref<8x1xf32, #tpu.memory_space<vmem>>, vector<8x1xf32>,
    } else {
    }
    %c0 = arith.constant 0 : index
    %c0_1 = arith.constant 0 : index
    %3 = vector.load %arg2[%c0, %c0_1] : memref<8x256xf32, #tpu.memory_space<vmem>>, vector<8x256xf32>
    %cst = arith.constant 9.99999997E-7 : f32
    %4 = vector.broadcast %cst : f32 to vector<8x256xf32>
    %5 = arith.maximumf %3, %4 : vector<8x256xf32>
    %6 = math.log %5 : vector<8x256xf32>
    %cst_2 = arith.constant 3.000000e+00 : f32
    %7 = vector.broadcast %cst_2 : f32 to vector<8x256xf32>
    %8 = arith.mulf %7, %6 : vector<8x256xf32>
    %9 = math.exp %8 : vector<8x256xf32>
    %c0_3 = arith.constant 0 : index
    %c0_4 = arith.constant 0 : index
    %10 = vector.load %arg4[%c0_3, %c0_4] : memref<8x1xf32, #tpu.memory_space<vmem>>, vector<8x1xf32>
    %cst_5 = arith.constant dense<0.000000e+00> : vector<8xf32>
    %11 = vector.multi_reduction <add>, %9, %cst_5 [1] : vector<8x256xf32> to vector<8xf32>
    %12 = vector.shape_cast %11 : vector<8xf32> to vector<8x1xf32>
    %13 = arith.addf %10, %12 : vector<8x1xf32>
    %c0_6 = arith.constant 0 : index
    %c0_7 = arith.constant 0 : index
    %14 = vector.load %arg4[%c0_6, %c0_7] : memref<8x1xf32, #tpu.memory_space<vmem>>, vector<8x1xf32>
    tpu.vector_store %arg4[%c0_6, %c0_7], %13 {strides = array<i32>} : memref<8x1xf32, #tpu.memory_space<vmem>>, vector<8x1xf32>,
    %c0_i32_8 = arith.constant 0 : i32
    %15 = arith.cmpi eq, %arg1, %c0_i32_8 : i32
    %16 = arith.extui %15 : i1 to i32
    %c0_i32_9 = arith.constant 0 : i32
    %17 = arith.cmpi ne, %16, %c0_i32_9 : i32
    scf.if %17 {
      %c0_10 = arith.constant 0 : index
      %c0_11 = arith.constant 0 : index
      %18 = vector.load %arg4[%c0_10, %c0_11] : memref<8x1xf32, #tpu.memory_space<vmem>>, vector<8x1xf32>
      %cst_12 = arith.constant 0.000000e+00 : f32
      %19 = vector.broadcast %cst_12 : f32 to vector<8x1xf32>
      %20 = arith.subf %18, %19 : vector<8x1xf32>
      %cst_13 = arith.constant 3.906250e-03 : f32
      %21 = vector.broadcast %cst_13 : f32 to vector<8x1xf32>
      %22 = arith.mulf %20, %21 : vector<8x1xf32>
      %cst_14 = arith.constant 1.000000e-18 : f32
      %23 = vector.broadcast %cst_14 : f32 to vector<8x1xf32>
      %24 = arith.maximumf %22, %23 : vector<8x1xf32>
      %25 = math.log %24 : vector<8x1xf32>
      %cst_15 = arith.constant 0.333333343 : f32
      %26 = vector.broadcast %cst_15 : f32 to vector<8x1xf32>
      %27 = arith.mulf %25, %26 : vector<8x1xf32>
      %28 = math.exp %27 : vector<8x1xf32>
      %c0_16 = arith.constant 0 : index
      %c0_17 = arith.constant 0 : index
      %29 = vector.load %arg3[%c0_16, %c0_17] : memref<8x1xf32, #tpu.memory_space<vmem>>, vector<8x1xf32>
      tpu.vector_store %arg3[%c0_16, %c0_17], %28 {strides = array<i32>} : memref<8x1xf32, #tpu.memory_space<vmem>>, vector<8x1xf32>,
    } else {
    }
    return
  }
  func.func @transform_0(%arg0: i32, %arg1: i32) -> (i32, i32) {
    %c0_i32 = arith.constant 0 : i32
    return %arg0, %arg1 : i32, i32
  }
  func.func @transform_1(%arg0: i32, %arg1: i32) -> (i32, i32) {
    %c0_i32 = arith.constant 0 : i32
    %c0_i32_0 = arith.constant 0 : i32
    return %arg0, %c0_i32 : i32, i32
  }
}

</mosaic_0001>

<bundles_post_ra>
// kernel: tpu_custom_call.1
= control target key start
LH: loop header
LB: loop body
LE: loop exit
PB: predicated region body
PF: predicated region fallthrough
CT: control target
= control target key end

     0   :  { %6 = vsyncpa [#allocation4], 0  ;;  %s102_s6 = smov [#allocation3]   ;;  %s132_s0 = inlined_call_operand.hbm [shape: f32[8,256], index: 0, kind: input, shape index: {}]   ;;  %s133_s1 = inlined_call_operand.vmem [shape: f32[8,1], index: 1, kind: output, shape index: {}]  }
   0x1   :  { %s13_s7 = sshll.u32 %s102_s6, 4  ;;  %s78_s10 = scalar_lea.hbm %s132_s0, 256  ;;  %s14_s7 = int_to_ptr.vmem [resolvable:$true] %s13_s7 }
   0x2   :  { %p79_p0 = scmp.ne.s32.totalorder %s132_s0, %s78_s10  ;;  %p82_p1 = scmp.lt.u32.totalorder %s78_s10, %s132_s0 }
   0x4   :  { %p84_p2 = pnand %p82_p1, %p79_p0 }
   0x6   :  { %87 = shalt.err (!%p84_p2)
}
   0x7   :  { %s88_s15 = scalar_lea.vmem %s14_s7, 256  ;;  %p93_p4 = scmp.lt.s32.totalorder %s14_s7, %s14_s7 }
   0x8   :  { %p89_p3 = scmp.ne.s32.totalorder %s14_s7, %s88_s15  ;;  %p94_p5 = scmp.lt.s32.totalorder %s88_s15, %s88_s15 }
   0xa   :  { %p95_p6 = por %p94_p5, %p93_p4 }
   0xc   :  { %p96_p7 = pnand %p95_p6, %p89_p3 }
   0xe   :  { %99 = shalt.err (!%p96_p7)
}
   0xf   :  { %16 = dma.hbm_to_vmem [thread:$0]  %s132_s0, 256, %s14_s7, [#allocation4]  }
  0x10   :  { %100 = dma.done.wait [#allocation4], 256  }
  0x11   :  { %101 = vsyncadd [#allocation4], 4294967040  ;;  %vm24_vm0 = vcmask 7168   ;;  %v103_v0 = vmov 0.0   ;;  %v26_v1 = vld [vmem:[#allocation3] sm:$0xff]  ;;  %v27_v2 = vld [vmem:[#allocation3 + $0x8] sm:$0xff] }
  0x12   :  { %25 = vst.msk [vmem:[#allocation2] sm:$0xff] %vm24_vm0, %v103_v0  ;;  %v28_v3 = vmax.f32 %v26_v1, 1e-06  ;;  %v29_v4 = vmax.f32 %v27_v2, 1e-06 }
  0x14   :  { %66 = vlog2.f32 %v28_v3 }
  0x15   :  { %68 = vlog2.f32 %v29_v4 }
  0x19   :  { %v40_v16 = vld [vmem:[#allocation2] sm:$0xff] }
  0x1e   :  { %v67_v5 = vpop.eup %66 }
  0x1f   :  { %v69_v6 = vpop.eup %68  ;;  %v31_v7 = vmul.f32 0.6931472, %v67_v5 }
  0x20   :  { %v33_v8 = vmul.f32 0.6931472, %v69_v6 }
  0x21   :  { %v34_v9 = vmul.f32 3.0, %v31_v7 }
  0x22   :  { %v35_v10 = vmul.f32 3.0, %v33_v8 }
  0x23   :  { %v36_v11 = vmul.f32 1.442695, %v34_v9 }
  0x24   :  { %v38_v12 = vmul.f32 1.442695, %v35_v10 }
  0x25   :  { %70 = vpow2.f32 %v36_v11 }
  0x26   :  { %72 = vpow2.f32 %v38_v12 }
  0x2f   :  { %v71_v13 = vpop.eup %70 }
  0x30   :  { %v73_v14 = vpop.eup %72 }
  0x31   :  { %v41_v15 = vadd.f32 %v73_v14, %v71_v13 }
  0x33   :  { %42 = vadd.xlane.f32.xlu0 %v41_v15 }
  0xc0   :  { %v43_v17 = vpop.xlane.xlu0 %42 }
  0xc1   :  { %v44_v18 = vadd.f32 %v43_v17, %v40_v16 }
  0xc3   :  { %46 = vst.msk [vmem:[#allocation2] sm:$0xff] %vm24_vm0, %v44_v18 }
  0xca   :  { %v50_v19 = vld [vmem:[#allocation2] sm:$0xff] }
  0xcb   :  { %v51_v20 = vmul.f32 0.00390625, %v50_v19 }
  0xcd   :  { %v52_v21 = vmax.f32 %v51_v20, 1e-18 }
  0xcf   :  { %74 = vlog2.f32 %v52_v21 }
  0xd9   :  { %v75_v22 = vpop.eup %74 }
  0xda   :  { %v54_v23 = vmul.f32 0.6931472, %v75_v22 }
  0xdc   :  { %v55_v24 = vmul.f32 0.33333334, %v54_v23 }
  0xde   :  { %v56_v25 = vmul.f32 1.442695, %v55_v24 }
  0xe0   :  { %76 = vpow2.f32 %v56_v25 }
  0xea   :  { %v77_v26 = vpop.eup %76 }
  0xeb   :  { %58 = vst.msk [vmem:[%s133_s1] sm:$0xff] %vm24_vm0, %v77_v26 }
  0xec   :  { %63 = vsyncpa [#allocation4], 1 }

</bundles_post_ra>
